<compile_context>
chip_gen: v7x
topology: tpu7x:2x2x1
jax: 0.10.0
libtpu: 0.0.40
codegen_flags: <defaults>
</compile_context>

<pallas_src>
import functools

import jax
import jax.numpy as jnp
from jax.experimental import pallas as pl
from jax.experimental.pallas import tpu as pltpu


# -----------------------------------------------------------------------------
# Compiler-parameter helpers (per-generation VMEM budget, per-call semantics)
# -----------------------------------------------------------------------------
@functools.lru_cache(maxsize=None)
def _vmem_limit_bytes():
    cap = None
    try:
        cap = getattr(pltpu.get_tpu_info(), "vmem_capacity_bytes", None)
    except Exception:
        cap = None
    if not cap:
        return 48 * 1024 * 1024  # conservative: fits every generation (incl. v7x)
    # Leave headroom for compiler scratch; cap at 100 MiB on 128 MiB parts.
    return int(min(int(cap) - 16 * 1024 * 1024, 100 * 1024 * 1024))


def _cparams(dims):
    return pltpu.CompilerParams(
        dimension_semantics=dims,
        vmem_limit_bytes=_vmem_limit_bytes(),
    )


def _row_tile(H, W, Cin, Cout, pool):
    """Largest even divisor of H (<= 64 rows) whose per-step VMEM footprint
    (double-buffered I/O + weights, f32 accumulator, padded-tile temporaries)
    fits the per-generation budget.  Shrinks automatically on v7x (64 MiB)."""
    budget = _vmem_limit_bytes() - 4 * 1024 * 1024
    Wo = W // 2 if pool else W

    def footprint(t):
        to = t // 2 if pool else t
        f = 2 * (t + 2) * W * Cin * 2              # input slab + halo rows (2 bufs)
        f += 2 * to * Wo * Cout * 2                # output slab (2 bufs)
        f += 2 * (9 * Cin * Cout * 2 + Cout * 4)   # weights + bias (2 bufs)
        f += 2 * t * W * Cout * 4                  # f32 accumulator + matmul result
        f += 2 * (t + 2) * (W + 2) * Cin * 2       # padded tile + tap-slice temps
        return f

    t = min(H, 64)
    while t >= 2:
        if H % t == 0 and t % 2 == 0 and footprint(t) <= budget:
            return t
        t -= 1
    return 2


def _pick_tile(n, cap):
    """Largest 128-multiple divisor of n that is <= cap (n itself otherwise)."""
    t = min(cap, n)
    t -= t % 128
    while t >= 128:
        if n % t == 0:
            return t
        t -= 128
    return n


# -----------------------------------------------------------------------------
# Kernels
# -----------------------------------------------------------------------------
def conv3x3_relu_kernel(x_ref, top_ref, bot_ref, w_ref, b_ref, o_ref, *, pool):
    """3x3 same-pad conv + bias + ReLU (+ optional fused 2x2 maxpool).

    x_ref:   (1, TO, W, Cin)  row slab: input rows [i*TO, (i+1)*TO)
    top_ref: (1, 1,  W, Cin)  input row i*TO-1 (clamped; zeroed when i == 0)
    bot_ref: (1, 1,  W, Cin)  input row (i+1)*TO (clamped; zeroed on last tile)
    w_ref:   (9*Cin, Cout)    tap-major (dy, dx), cin-minor weights (bf16)
    b_ref:   (1, Cout)        bias (f32)
    o_ref:   (1, TO, W, Cout) or (1, TO//2, W//2, Cout) when pool=True
    """
    i = pl.program_id(1)
    _, TO, W, Cin = x_ref.shape
    Cout = w_ref.shape[-1]

    top = jnp.where(i > 0, top_ref[0], jnp.zeros_like(top_ref[0]))
    bot = jnp.where(i < pl.num_programs(1) - 1, bot_ref[0],
                    jnp.zeros_like(bot_ref[0]))

    # (TO+2, W+2, Cin) zero-bordered tile built in VMEM (replaces the old
    # per-layer padded-activation HBM round trip).
    xt = jnp.concatenate([top, x_ref[0], bot], axis=0)           # (TO+2, W, Cin)
    zc = jnp.zeros((TO + 2, 1, Cin), xt.dtype)
    xt = jnp.concatenate([zc, xt, zc], axis=1)                   # (TO+2, W+2, Cin)

    # Accumulate the 9 taps straight into the f32 accumulator (no im2col slab).
    #   Cin >= 128: one K=Cin matmul per tap.
    #   Cin == 64 : tap pairs packed along K (K=128) so the MXU isn't 75% idle.
    #   Cin == 3  : all 9 taps in one K=27 matmul.
    group = 1 if Cin >= 128 else max(1, min(9, 128 // Cin))
    acc = jnp.zeros((TO * W, Cout), jnp.float32)
    for t0 in range(0, 9, group):
        g = min(group, 9 - t0)
        pieces = []
        for t in range(t0, t0 + g):
            dy, dx = divmod(t, 3)
            pieces.append(xt[dy:dy + TO, dx:dx + W, :].reshape(TO * W, Cin))
        lhs = pieces[0] if g == 1 else jnp.concatenate(pieces, axis=-1)
        acc = acc + jnp.dot(lhs, w_ref[t0 * Cin:(t0 + g) * Cin, :],
                            preferred_element_type=jnp.float32)

    y = jnp.maximum(acc + b_ref[...], 0.0).reshape(TO, W, Cout)  # bias + ReLU
    if pool:  # fused 2x2 maxpool stride 2 (TO even -> pools never straddle tiles)
        r = jnp.maximum(y[0::2], y[1::2])
        y = jnp.maximum(r[:, 0::2, :], r[:, 1::2, :])
    o_ref[0] = y.astype(o_ref.dtype)


def linear_kernel(x_ref, w_ref, b_ref, o_ref, acc_ref):
    """K-tiled out = x @ w + b with an f32 VMEM accumulator."""
    k = pl.program_id(1)

    @pl.when(k == 0)
    def _():
        acc_ref[...] = jnp.zeros_like(acc_ref)

    acc_ref[...] += jnp.dot(x_ref[...], w_ref[...],
                            preferred_element_type=jnp.float32)

    @pl.when(k == pl.num_programs(1) - 1)
    def _():
        o_ref[...] = (acc_ref[...] + b_ref[...]).astype(o_ref.dtype)


# -----------------------------------------------------------------------------
# Wrappers (pallas_call setup)
# -----------------------------------------------------------------------------
def conv3x3_relu(x_nhwc, w, b, *, pool):
    B, H, W, Cin = x_nhwc.shape
    assert H % 2 == 0 and W % 2 == 0
    Cout = w.shape[-1]
    TO = _row_tile(H, W, Cin, Cout, pool)
    nI = H // TO

    Ho, Wo = (H // 2, W // 2) if pool else (H, W)
    To_out = TO // 2 if pool else TO

    # TODO(synk): lane-dense (W/2, 128) packing for the Cout=64 conv1 block, a
    # Cout-split grid axis for dual-TC v7x when B*nI < 2, and single-buffered
    # weight blocks (pl.Buffered(1)) once validated on the target jax build.
    return pl.pallas_call(
        functools.partial(conv3x3_relu_kernel, pool=pool),
        out_shape=jax.ShapeDtypeStruct((B, Ho, Wo, Cout), jnp.bfloat16),
        grid=(B, nI),
        in_specs=[
            pl.BlockSpec((1, TO, W, Cin), lambda bi, i: (bi, i, 0, 0)),
            # 1-row halos: block row size 1 => block index == element row.
            pl.BlockSpec((1, 1, W, Cin),
                         lambda bi, i: (bi, jnp.maximum(i * TO - 1, 0), 0, 0)),
            pl.BlockSpec((1, 1, W, Cin),
                         lambda bi, i: (bi, jnp.minimum(i * TO + TO, H - 1), 0, 0)),
            # Grid-invariant weight/bias blocks (Pallas skips re-DMA of
            # unchanged blocks; the footprint model above assumes 2 buffers).
            pl.BlockSpec((9 * Cin, Cout), lambda bi, i: (0, 0)),
            pl.BlockSpec((1, Cout), lambda bi, i: (0, 0)),
        ],
        out_specs=pl.BlockSpec((1, To_out, Wo, Cout), lambda bi, i: (bi, i, 0, 0)),
        compiler_params=_cparams(("parallel", "parallel")),
    )(x_nhwc, x_nhwc, x_nhwc, w, b)


def linear(x, w, bias):
    B, F = x.shape
    N = w.shape[1]
    tn = _pick_tile(N, 2048)   # weight-streaming FC: big tiles, few grid steps
    tk = _pick_tile(F, 1792)
    # TODO(synk): optional int8 (v5e/v6e) / fp8 (v7x) FC-weight quantization to
    # halve the HBM weight stream.
    return pl.pallas_call(
        linear_kernel,
        out_shape=jax.ShapeDtypeStruct((B, N), jnp.float32),
        grid=(N // tn, F // tk),
        in_specs=[
            pl.BlockSpec((B, tk), lambda n, k: (0, k)),
            pl.BlockSpec((tk, tn), lambda n, k: (k, n)),
            pl.BlockSpec((1, tn), lambda n, k: (0, n)),
        ],
        out_specs=pl.BlockSpec((B, tn), lambda n, k: (0, n)),
        scratch_shapes=[pltpu.VMEM((B, tn), jnp.float32)],
        compiler_params=_cparams(("parallel", "arbitrary")),
    )(x, w, bias)


# -----------------------------------------------------------------------------
# VGG19 model (features + classifier[:1])
# -----------------------------------------------------------------------------
VGG19_CFG = [64, 64, "M", 128, 128, "M", 256, 256, 256, 256, "M",
             512, 512, 512, 512, "M", 512, 512, 512, 512, "M"]


def _conv_plan():
    plan = []
    for idx, v in enumerate(VGG19_CFG):
        if v == "M":
            continue
        pool_after = (idx + 1 < len(VGG19_CFG)) and (VGG19_CFG[idx + 1] == "M")
        plan.append((v, pool_after))
    return plan


_CONV_PLAN = _conv_plan()  # static: (Cout, fuse-maxpool-after) per conv layer


def init_params(key, in_ch=3, spatial=32):
    """Deterministic synthetic weights matching VGG19 layer shapes (bf16)."""
    convs = []
    c = in_ch
    for cout, _pool in _CONV_PLAN:
        key, k1, k2 = jax.random.split(key, 3)
        # Real torch weights (Cout, Cin, 3, 3) would need transpose(2,3,1,0)
        # before this reshape to (9*Cin, Cout) (tap-major, cin-minor).
        w = (jax.random.normal(k1, (3, 3, c, cout), jnp.float32)
             * jnp.sqrt(2.0 / (9.0 * c))).reshape(9 * c, cout).astype(jnp.bfloat16)
        b = jax.random.normal(k2, (1, cout), jnp.float32) * 0.01
        convs.append((w, b))
        c = cout
    n_pool = sum(1 for v in VGG19_CFG if v == "M")
    fh = spatial // (2 ** n_pool)
    in_features = c * fh * fh  # == 25088 for the pretrained 224x224 case
    key, k1, k2 = jax.random.split(key, 3)
    fc_w = (jax.random.normal(k1, (in_features, 4096), jnp.float32)
            / jnp.sqrt(float(in_features))).astype(jnp.bfloat16)
    fc_b = jax.random.normal(k2, (1, 4096), jnp.float32) * 0.01
    return {"convs": convs, "fc_w": fc_w, "fc_b": fc_b}


def vgg19_forward(x_nchw, params):
    """Equivalent of Vgg19.forward: features(x) -> flatten -> Linear(., 4096)."""
    x = jnp.transpose(x_nchw, (0, 2, 3, 1)).astype(jnp.bfloat16)  # NCHW -> NHWC
    for (w, b), (_cout, pool) in zip(params["convs"], _CONV_PLAN):
        x = conv3x3_relu(x, w, b, pool=pool)
    B = x.shape[0]
    # Flatten in NCHW order to match torch's hidden.view(B, -1).
    hidden = jnp.transpose(x, (0, 3, 1, 2)).reshape(B, -1)
    return linear(hidden, params["fc_w"], params["fc_b"])


# -----------------------------------------------------------------------------
# Reference conv (layout / halo correctness check)
# -----------------------------------------------------------------------------
def _conv_ref(x, w_flat, b, pool):
    cin = x.shape[-1]
    cout = w_flat.shape[-1]
    w4 = w_flat.astype(jnp.float32).reshape(3, 3, cin, cout)
    y = jax.lax.conv_general_dilated(
        x.astype(jnp.float32), w4, (1, 1), "SAME",
        dimension_numbers=("NHWC", "HWIO", "NHWC"))
    y = jnp.maximum(y + b.reshape(1, 1, 1, cout), 0.0)
    if pool:
        y = jnp.maximum(y[:, 0::2], y[:, 1::2])
        y = jnp.maximum(y[:, :, 0::2], y[:, :, 1::2])
    return y


# -----------------------------------------------------------------------------
if __name__ == "__main__":
    key = jax.random.PRNGKey(0)
    kx, kp, kc = jax.random.split(key, 3)

    # Spot-check the conv kernel (all three Cin paths + halo + fused pool)
    # against lax.conv_general_dilated with matching bf16-rounded weights.
    for cin, cout, pool in ((3, 32, False), (64, 64, True), (128, 64, False)):
        kc, k1, k2, k3 = jax.random.split(kc, 4)
        xs = jax.random.normal(k1, (1, 8, 8, cin), jnp.float32).astype(jnp.bfloat16)
        wf = (jax.random.normal(k2, (3, 3, cin, cout), jnp.float32)
              * jnp.sqrt(2.0 / (9.0 * cin))).astype(jnp.bfloat16)
        bf = jax.random.normal(k3, (1, cout), jnp.float32) * 0.01
        got = conv3x3_relu(xs, wf.reshape(9 * cin, cout), bf,
                           pool=pool).astype(jnp.float32)
        ref = _conv_ref(xs, wf.reshape(9 * cin, cout), bf, pool)
        assert bool(jnp.allclose(got, ref, rtol=3e-2, atol=3e-2)), \
            f"conv mismatch (cin={cin}, cout={cout}, pool={pool})"

    # Full forward at small demo shapes: batch=2, 3 input channels (VGG needs
    # 3), 32x32 spatial so the 5 fused maxpools reduce to 1x1 (224x224 real).
    B, C, S = 2, 3, 32
    x = jax.random.normal(kx, (B, C, S, S), jnp.float32)
    params = init_params(kp, in_ch=C, spatial=S)

    fwd = jax.jit(vgg19_forward)
    out = jax.block_until_ready(fwd(x, params))

    assert out.shape == (B, 4096), out.shape
    assert out.dtype == jnp.float32
    assert bool(jnp.all(jnp.isfinite(out)))
    print("KERNEL_OK")
</pallas_src>

<mosaic_0001>
module attributes {stable_mosaic.version = 11 : i64} {
  func.func @conv3x3_relu_kernel(%arg0: i32, %arg1: i32, %arg2: memref<1x8x8x3xbf16, #tpu.memory_space<vmem>>, %arg3: memref<1x1x8x3xbf16, #tpu.memory_space<vmem>>, %arg4: memref<1x1x8x3xbf16, #tpu.memory_space<vmem>>, %arg5: memref<27x32xbf16, #tpu.memory_space<vmem>>, %arg6: memref<1x32xf32, #tpu.memory_space<vmem>>, %arg7: memref<1x8x8x32xbf16, #tpu.memory_space<vmem>>) attributes {dimension_semantics = [#tpu.dimension_semantics<parallel>, #tpu.dimension_semantics<parallel>], iteration_bounds = array<i64: 1, 1>, scalar_prefetch = 0 : i64, scratch_operands = 0 : i64, tpu.core_type = #tpu.core_type<tc>, window_params = [{transform_indices = @transform_0, window_bounds = array<i64: 1, 8, 8, 3>}, {transform_indices = @transform_1, window_bounds = array<i64: 1, 1, 8, 3>}, {transform_indices = @transform_2, window_bounds = array<i64: 1, 1, 8, 3>}, {pipeline_mode = #tpu.pipeline_mode<synchronous>, transform_indices = @transform_3, window_bounds = array<i64: 27, 32>}, {pipeline_mode = #tpu.pipeline_mode<synchronous>, transform_indices = @transform_4, window_bounds = array<i64: 1, 32>}, {transform_indices = @transform_5, window_bounds = array<i64: 1, 8, 8, 32>}]} {
    %c0_i32 = arith.constant 0 : i32
    %0 = arith.cmpi sgt, %arg1, %c0_i32 : i32
    %c0 = arith.constant 0 : index
    %c0_0 = arith.constant 0 : index
    %c0_1 = arith.constant 0 : index
    %c0_2 = arith.constant 0 : index
    %1 = vector.load %arg3[%c0, %c0_0, %c0_1, %c0_2] : memref<1x1x8x3xbf16, #tpu.memory_space<vmem>>, vector<1x1x8x3xbf16>
    %2 = vector.shape_cast %1 : vector<1x1x8x3xbf16> to vector<1x8x3xbf16>
    %cst = arith.constant 0.000000e+00 : bf16
    %3 = vector.broadcast %cst : bf16 to vector<1x8x3xbf16>
    %4 = arith.select %0, %2, %3 : vector<1x8x3xbf16>
    %c0_i32_3 = arith.constant 0 : i32
    %5 = arith.cmpi slt, %arg1, %c0_i32_3 : i32
    %c0_4 = arith.constant 0 : index
    %c0_5 = arith.constant 0 : index
    %c0_6 = arith.constant 0 : index
    %c0_7 = arith.constant 0 : index
    %6 = vector.load %arg4[%c0_4, %c0_5, %c0_6, %c0_7] : memref<1x1x8x3xbf16, #tpu.memory_space<vmem>>, vector<1x1x8x3xbf16>
    %7 = vector.shape_cast %6 : vector<1x1x8x3xbf16> to vector<1x8x3xbf16>
    %cst_8 = arith.constant 0.000000e+00 : bf16
    %8 = vector.broadcast %cst_8 : bf16 to vector<1x8x3xbf16>
    %9 = arith.select %5, %7, %8 : vector<1x8x3xbf16>
    %c0_9 = arith.constant 0 : index
    %c0_10 = arith.constant 0 : index
    %c0_11 = arith.constant 0 : index
    %c0_12 = arith.constant 0 : index
    %10 = vector.load %arg2[%c0_9, %c0_10, %c0_11, %c0_12] : memref<1x8x8x3xbf16, #tpu.memory_space<vmem>>, vector<1x8x8x3xbf16>
    %11 = vector.shape_cast %10 : vector<1x8x8x3xbf16> to vector<8x8x3xbf16>
    %12 = tpu.concatenate %4, %11, %9 in 0 : vector<1x8x3xbf16>, vector<8x8x3xbf16>, vector<1x8x3xbf16> -> vector<10x8x3xbf16>
    %cst_13 = arith.constant 0.000000e+00 : bf16
    %13 = vector.broadcast %cst_13 : bf16 to vector<10x1x3xbf16>
    %14 = tpu.concatenate %13, %12, %13 in 1 : vector<10x1x3xbf16>, vector<10x8x3xbf16>, vector<10x1x3xbf16> -> vector<10x10x3xbf16>
    %cst_14 = arith.constant 0.000000e+00 : f32
    %15 = vector.broadcast %cst_14 : f32 to vector<64x32xf32>
    %16 = vector.extract_strided_slice %14 {offsets = [0, 0, 0], sizes = [8, 8, 3], strides = [1, 1, 1]} : vector<10x10x3xbf16> to vector<8x8x3xbf16>
    %17 = vector.shape_cast %16 : vector<8x8x3xbf16> to vector<64x3xbf16>
    %18 = vector.extract_strided_slice %14 {offsets = [0, 1, 0], sizes = [8, 8, 3], strides = [1, 1, 1]} : vector<10x10x3xbf16> to vector<8x8x3xbf16>
    %19 = vector.shape_cast %18 : vector<8x8x3xbf16> to vector<64x3xbf16>
    %20 = vector.extract_strided_slice %14 {offsets = [0, 2, 0], sizes = [8, 8, 3], strides = [1, 1, 1]} : vector<10x10x3xbf16> to vector<8x8x3xbf16>
    %21 = vector.shape_cast %20 : vector<8x8x3xbf16> to vector<64x3xbf16>
    %22 = vector.extract_strided_slice %14 {offsets = [1, 0, 0], sizes = [8, 8, 3], strides = [1, 1, 1]} : vector<10x10x3xbf16> to vector<8x8x3xbf16>
    %23 = vector.shape_cast %22 : vector<8x8x3xbf16> to vector<64x3xbf16>
    %24 = vector.extract_strided_slice %14 {offsets = [1, 1, 0], sizes = [8, 8, 3], strides = [1, 1, 1]} : vector<10x10x3xbf16> to vector<8x8x3xbf16>
    %25 = vector.shape_cast %24 : vector<8x8x3xbf16> to vector<64x3xbf16>
    %26 = vector.extract_strided_slice %14 {offsets = [1, 2, 0], sizes = [8, 8, 3], strides = [1, 1, 1]} : vector<10x10x3xbf16> to vector<8x8x3xbf16>
    %27 = vector.shape_cast %26 : vector<8x8x3xbf16> to vector<64x3xbf16>
    %28 = vector.extract_strided_slice %14 {offsets = [2, 0, 0], sizes = [8, 8, 3], strides = [1, 1, 1]} : vector<10x10x3xbf16> to vector<8x8x3xbf16>
    %29 = vector.shape_cast %28 : vector<8x8x3xbf16> to vector<64x3xbf16>
    %30 = vector.extract_strided_slice %14 {offsets = [2, 1, 0], sizes = [8, 8, 3], strides = [1, 1, 1]} : vector<10x10x3xbf16> to vector<8x8x3xbf16>
    %31 = vector.shape_cast %30 : vector<8x8x3xbf16> to vector<64x3xbf16>
    %32 = vector.extract_strided_slice %14 {offsets = [2, 2, 0], sizes = [8, 8, 3], strides = [1, 1, 1]} : vector<10x10x3xbf16> to vector<8x8x3xbf16>
    %33 = vector.shape_cast %32 : vector<8x8x3xbf16> to vector<64x3xbf16>
    %34 = tpu.concatenate %17, %19, %21, %23, %25, %27, %29, %31, %33 in 1 : vector<64x3xbf16>, vector<64x3xbf16>, vector<64x3xbf16>, vector<64x3xbf16>, vector<64x3xbf16>, vector<64x3xbf16>, vector<64x3xbf16>, vector<64x3xbf16>, vector<64x3xbf16> -> vector<64x27xbf16>
    %c0_15 = arith.constant 0 : index
    %c0_16 = arith.constant 0 : index
    %35 = vector.load %arg5[%c0_15, %c0_16] : memref<27x32xbf16, #tpu.memory_space<vmem>>, vector<27x32xbf16>
    %cst_17 = arith.constant dense<0.000000e+00> : vector<64x32xf32>
    %36 = tpu.matmul %34, %35, %cst_17 {dimension_numbers = #tpu.dot_dimension_numbers<[1], [0], [0], [1], [0, 0, 1, 1], [], []>} : vector<64x27xbf16>, vector<27x32xbf16>, vector<64x32xf32> -> vector<64x32xf32>
    %37 = arith.addf %15, %36 : vector<64x32xf32>
    %c0_18 = arith.constant 0 : index
    %c0_19 = arith.constant 0 : index
    %38 = vector.load %arg6[%c0_18, %c0_19] : memref<1x32xf32, #tpu.memory_space<vmem>>, vector<1x32xf32>
    %39 = vector.broadcast %38 : vector<1x32xf32> to vector<64x32xf32>
    %40 = arith.addf %37, %39 : vector<64x32xf32>
    %cst_20 = arith.constant 0.000000e+00 : f32
    %41 = vector.broadcast %cst_20 : f32 to vector<64x32xf32>
    %42 = arith.maximumf %40, %41 : vector<64x32xf32>
    %43 = vector.shape_cast %42 : vector<64x32xf32> to vector<8x8x32xf32>
    %44 = arith.truncf %43 : vector<8x8x32xf32> to vector<8x8x32xbf16>
    %c0_21 = arith.constant 0 : index
    %c0_22 = arith.constant 0 : index
    %c0_23 = arith.constant 0 : index
    %c0_24 = arith.constant 0 : index
    %45 = vector.load %arg7[%c0_21, %c0_22, %c0_23, %c0_24] : memref<1x8x8x32xbf16, #tpu.memory_space<vmem>>, vector<1x8x8x32xbf16>
    %46 = vector.shape_cast %45 : vector<1x8x8x32xbf16> to vector<8x8x32xbf16>
    %47 = vector.shape_cast %44 : vector<8x8x32xbf16> to vector<1x8x8x32xbf16>
    tpu.vector_store %arg7[%c0_21, %c0_22, %c0_23, %c0_24], %47 {strides = array<i32>} : memref<1x8x8x32xbf16, #tpu.memory_space<vmem>>, vector<1x8x8x32xbf16>,
    return
  }
  func.func @transform_0(%arg0: i32, %arg1: i32) -> (i32, i32, i32, i32) {
    %c0_i32 = arith.constant 0 : i32
    %c0_i32_0 = arith.constant 0 : i32
    %c0_i32_1 = arith.constant 0 : i32
    return %arg0, %arg1, %c0_i32, %c0_i32_0 : i32, i32, i32, i32
  }
  func.func @transform_1(%arg0: i32, %arg1: i32) -> (i32, i32, i32, i32) {
    %c8_i32 = arith.constant 8 : i32
    %0 = arith.muli %arg1, %c8_i32 : i32
    %c1_i32 = arith.constant 1 : i32
    %1 = arith.subi %0, %c1_i32 : i32
    %c0_i32 = arith.constant 0 : i32
    %2 = arith.maxsi %1, %c0_i32 : i32
    %c0_i32_0 = arith.constant 0 : i32
    %c0_i32_1 = arith.constant 0 : i32
    %c0_i32_2 = arith.constant 0 : i32
    return %arg0, %2, %c0_i32_0, %c0_i32_1 : i32, i32, i32, i32
  }
  func.func @transform_2(%arg0: i32, %arg1: i32) -> (i32, i32, i32, i32) {
    %c8_i32 = arith.constant 8 : i32
    %0 = arith.muli %arg1, %c8_i32 : i32
    %c8_i32_0 = arith.constant 8 : i32
    %1 = arith.addi %0, %c8_i32_0 : i32
    %c7_i32 = arith.constant 7 : i32
    %2 = arith.minsi %1, %c7_i32 : i32
    %c0_i32 = arith.constant 0 : i32
    %c0_i32_1 = arith.constant 0 : i32
    %c0_i32_2 = arith.constant 0 : i32
    return %arg0, %2, %c0_i32, %c0_i32_1 : i32, i32, i32, i32
  }
  func.func @transform_3(%arg0: i32, %arg1: i32) -> (i32, i32) {
    %c0_i32 = arith.constant 0 : i32
    %c0_i32_0 = arith.constant 0 : i32
    %c0_i32_1 = arith.constant 0 : i32
    return %c0_i32, %c0_i32_0 : i32, i32
  }
  func.func @transform_4(%arg0: i32, %arg1: i32) -> (i32, i32) {
    %c0_i32 = arith.constant 0 : i32
    %c0_i32_0 = arith.constant 0 : i32
    %c0_i32_1 = arith.constant 0 : i32
    return %c0_i32, %c0_i32_0 : i32, i32
  }
  func.func @transform_5(%arg0: i32, %arg1: i32) -> (i32, i32, i32, i32) {
    %c0_i32 = arith.constant 0 : i32
    %c0_i32_0 = arith.constant 0 : i32
    %c0_i32_1 = arith.constant 0 : i32
    return %arg0, %arg1, %c0_i32, %c0_i32_0 : i32, i32, i32, i32
  }
}

</mosaic_0001>

<bundles_post_ra>
// kernel: tpu_custom_call.1
= control target key start
LH: loop header
LB: loop body
LE: loop exit
PB: predicated region body
PF: predicated region fallthrough
CT: control target
= control target key end

     0   :  { %vm216_vm0 = vcmask 1040384   ;;  %vm217_vm1 = vsmask.f32 256  ;;  %vm229_vm2 = vcmask 1044480   ;;  %vm230_vm3 = vsmask.f32 4352  ;;  %s1405_s0 = inlined_call_operand.vmem [shape: bf16[1,8,8,3], index: 0, kind: input, shape index: {}]   ;;  %s1406_s1 = inlined_call_operand.vmem [shape: bf16[1,8,8,3], index: 1, kind: input, shape index: {}]   ;;  %s1407_s2 = inlined_call_operand.vmem [shape: bf16[1,8,8,3], index: 2, kind: input, shape index: {}]   ;;  %s1408_s3 = inlined_call_operand.vmem [shape: bf16[27,32], index: 3, kind: input, shape index: {}]   ;;  %s1409_s4 = inlined_call_operand.vmem [shape: f32[1,32], index: 4, kind: input, shape index: {}]   ;;  %s1410_s5 = inlined_call_operand.hbm [shape: bf16[1,8,8,32], index: 5, kind: output, shape index: {}]  }
   0x1   :  { %v931_v0 = vld [vmem:[%s1405_s0 + $0x10] ss:$0 sps:$4 sm:$0xff]   ;;  %v932_v1 = vld [vmem:[%s1405_s0 + $0x14] ss:$0 sps:$4 sm:$0xff]   ;;  %v933_v7 = vld [vmem:[%s1405_s0] ss:$0 sps:$4 sm:$0xff]  }
   0x2   :  { %v172_v2 = vshrl.u32 %v931_v0, 16  ;;  %v175_v3 = vshll.u32 %v931_v0, 16  ;;  %v179_v4 = vshrl.u32 %v932_v1, 16  ;;  %v182_v5 = vshll.u32 %v932_v1, 16  ;;  %v934_v8 = vld [vmem:[%s1405_s0 + $0x4] ss:$0 sps:$4 sm:$0xff]   ;;  %vm1020_vm4 = vmand %vm216_vm0, %vm217_vm1 }
   0x3   :  { %vm397_vm5 = vcmask 1042432   ;;  %vm398_vm6 = vcmask 1046532   ;;  %vm1025_vm7 = vmand %vm229_vm2, %vm230_vm3  ;;  %v144_v13 = vshrl.u32 %v933_v7, 16  ;;  %v147_v14 = vshll.u32 %v933_v7, 16  ;;  %v935_v16 = vld [vmem:[%s1405_s0 + $0x18] ss:$0 sps:$4 sm:$0xff]  }
   0x4   :  { %v174_v6 = vrot.slane %v172_v2, 7  ;;  %v181_v9 = vrot.slane %v179_v4, 7  ;;  %v151_v15 = vshrl.u32 %v934_v8, 16  ;;  %v154_v18 = vshll.u32 %v934_v8, 16  ;;  %v936_v19 = vld [vmem:[%s1405_s0 + $0x1c] ss:$0 sps:$4 sm:$0xff]  }
   0x5   :  { %v146_v21 = vrot.slane %v144_v13, 7  ;;  %v186_v23 = vshrl.u32 %v935_v16, 16  ;;  %v189_v26 = vshll.u32 %v935_v16, 16  ;;  %v193_v27 = vshrl.u32 %v936_v19, 16  ;;  %v937_v28 = vld [vmem:[%s1405_s0 + $0x8] ss:$0 sps:$4 sm:$0xff]  }
   0x6   :  { %v177_v11 = vor.u32 %v175_v3, %v174_v6  ;;  %v184_v17 = vor.u32 %v182_v5, %v181_v9  ;;  %v153_v22 = vrot.slane %v151_v15, 7  ;;  %v196_v40 = vshll.u32 %v936_v19, 16  ;;  %v938_v41 = vld [vmem:[%s1405_s0 + $0xc] ss:$0 sps:$4 sm:$0xff]   ;;  %s965_s7 = smov 9  }
   0x7   :  { %v149_v32 = vor.u32 %v147_v14, %v146_v21  ;;  %v188_v38 = vrot.slane %v186_v23, 7  ;;  %v195_v39 = vrot.slane %v193_v27, 7  ;;  %v158_v44 = vshrl.u32 %v937_v28, 16 }
   0x8   :  { %v224_v20 = vsel %vm1020_vm4, 0, %v177_v11  ;;  %v225_v24 = vsel %vm1020_vm4, 0, %v184_v17  ;;  %v156_v36 = vor.u32 %v154_v18, %v153_v22  ;;  %v161_v45 = vshll.u32 %v937_v28, 16 }
   0x9   :  { %v1041_v25 = vsel %vm1025_vm7, %v224_v20, 0  ;;  %v1048_v29 = vsel %vm1025_vm7, %v225_v24, 0  ;;  %v220_v37 = vsel %vm1020_vm4, 0, %v149_v32  ;;  %v191_v49 = vor.u32 %v189_v26, %v188_v38 }
   0xa   :  { %v1052_v30 = vcombine.low %v1041_v25, %v1041_v25  ;;  %v1056_v31 = vcombine.high %v1041_v25, %v1041_v25  ;;  %v1060_v33 = vcombine.low %v1048_v29, %v1048_v29  ;;  %v1064_v34 = vcombine.high %v1048_v29, %v1048_v29 }
   0xb   :  { %v876_v35 = vcombine.low %v1041_v25, %v1048_v29  ;;  %v221_v42 = vsel %vm1020_vm4, 0, %v156_v36  ;;  %v1078_v43 = vsel %vm1025_vm7, %v220_v37, 0 }
   0xc   :  { %v1082_v46 = vsel %vm1025_vm7, %v221_v42, 0  ;;  %v1086_v47 = vcombine.low %v1078_v43, %v1078_v43  ;;  %v1090_v48 = vcombine.high %v1078_v43, %v1078_v43 }
   0xd   :  { %530 = vrot.lane.b32.xlu1 %v876_v35, %s965_s7 }
   0xe   :  { %10 = vsyncpa [#allocation3], 0  ;;  %v1094_v50 = vcombine.low %v1082_v46, %v1082_v46  ;;  %v1098_v51 = vcombine.high %v1082_v46, %v1082_v46  ;;  %v874_v52 = vcombine.low %v1078_v43, %v1082_v46  ;;  %v198_v53 = vor.u32 %v196_v40, %v195_v39  ;;  %s967_s0 = smov 6   ;;  %s968_s8 = smov 3  }
   0xf   :  { %v226_v54 = vsel %vm1020_vm4, 0, %v191_v49  ;;  %v160_v55 = vrot.slane %v158_v44, 7  ;;  %v165_v56 = vshrl.u32 %v938_v41, 16  ;;  %v168_v57 = vshll.u32 %v938_v41, 16  ;;  %vm1106_vm8 = vmor %vm397_vm5, %vm398_vm6  ;;  %s969_s9 = smov 12   ;;  %s970_s10 = smov 15  }
  0x10   :  { %526 = vrot.lane.b32.xlu0 %v874_v52, %s965_s7  ;;  %v227_v59 = vsel %vm1020_vm4, 0, %v198_v53  ;;  %v1115_v60 = vsel %vm1025_vm7, %v226_v54, 0  ;;  %v853_v61 = vrot.slane %v1052_v30, 9  ;;  %v422_v62 = vrot.slane %v1056_v31, 5  ;;  %s971_s11 = smov 18   ;;  %s973_s16 = smov 21  }
  0x11   :  { %v1121_v63 = vsel %vm1025_vm7, %v227_v59, 0  ;;  %v1125_v0 = vcombine.low %v1115_v60, %v1115_v60  ;;  %v163_v1 = vor.u32 %v161_v45, %v160_v55  ;;  %v167_v2 = vrot.slane %v165_v56, 7 }
  0x12   :  { %v1129_v3 = vcombine.low %v1121_v63, %v1121_v63  ;;  %v877_v4 = vcombine.low %v1115_v60, %v1121_v63  ;;  %v1135_v5 = vsel %vm1106_vm8, %v853_v61, %v422_v62  ;;  %v966_v6 = vmov 0  }
  0x13   :  { %v822_v7 = vcombine.low %v966_v6, %v966_v6  ;;  %v170_v8 = vor.u32 %v168_v57, %v167_v2  ;;  %v222_v9 = vsel %vm1020_vm4, 0, %v163_v1  ;;  %v849_v11 = vrot.slane %v1086_v47, 9 }
  0x14   :  { %v406_v13 = vrot.slane %v1090_v48, 5  ;;  %532 = vrot.lane.b32.xlu1 %v877_v4, %s965_s7  ;;  %v1144_v14 = vsel %vm1025_vm7, %v222_v9, 0  ;;  %v1148_v17 = vcombine.high %v1115_v60, %v1115_v60  ;;  %v854_v21 = vrot.slane %v1060_v33, 9 }
  0x15   :  { %v137_v15 = vshrl.u32 %v822_v7, 16  ;;  %v140_v16 = vshll.u32 %v822_v7, 16  ;;  %v223_v18 = vsel %vm1020_vm4, 0, %v170_v8  ;;  %v838_v19 = vcombine.low %v1144_v14, %v1144_v14 }
  0x16   :  { %v1156_v20 = vsel %vm1106_vm8, %v849_v11, %v406_v13  ;;  %v1161_v22 = vsel %vm1025_vm7, %v223_v18, 0  ;;  %v426_v24 = vrot.slane %v1064_v34, 5  ;;  %v855_v26 = vrot.slane %v1125_v0, 9 }
  0x17   :  { %v139_v23 = vrot.slane %v137_v15, 7  ;;  %v1167_v27 = vcombine.low %v1161_v22, %v1161_v22  ;;  %v875_v28 = vcombine.low %v1144_v14, %v1161_v22  ;;  %v1173_v32 = vcombine.high %v1161_v22, %v1161_v22 }
  0x18   :  { %v430_v35 = vrot.slane %v1148_v17, 5  ;;  %v1178_v37 = vsel %vm1106_vm8, %v854_v21, %v426_v24  ;;  %v839_v38 = vcombine.high %v1144_v14, %v1144_v14  ;;  %v850_v39 = vrot.slane %v1094_v50, 9 }
  0x19   :  { %v142_v36 = vor.u32 %v140_v16, %v139_v23  ;;  %528 = vrot.lane.b32.xlu0 %v875_v28, %s965_s7  ;;  %v852_v40 = vrot.slane %v1167_v27, 9  ;;  %v418_v41 = vrot.slane %v1173_v32, 5  ;;  %v410_v44 = vrot.slane %v1098_v51, 5 }
  0x1a   :  { %v1188_v42 = vsel %vm1106_vm8, %v855_v26, %v430_v35  ;;  %v851_v52 = vrot.slane %v838_v19, 9  ;;  %v414_v53 = vrot.slane %v839_v38, 5  ;;  %vm282_vm9 = vsmask.f32 3328 }
  0x1b   :  { %v219_v45 = vsel %vm1020_vm4, 0, %v142_v36  ;;  %v1195_v49 = vcombine.low %v1178_v37, %v1188_v42  ;;  %v1199_v54 = vsel %vm1106_vm8, %v852_v40, %v418_v41  ;;  %v1207_v56 = vsel %vm1106_vm8, %v850_v39, %v410_v44 }
  0x1c   :  { %v1203_v55 = vsel %vm1025_vm7, %v219_v45, 0  ;;  %v1211_v10 = vcombine.low %v1199_v54, %v1135_v5  ;;  %v1219_v12 = vsel %vm1106_vm8, %v851_v52, %v414_v53  ;;  %vm283_vm10 = vsmask.f32 7440 }
  0x1d   :  { %v832_v57 = vcombine.low %v1203_v55, %v1203_v55  ;;  %v833_v59 = vcombine.high %v1203_v55, %v1203_v55  ;;  %v1223_v61 = vcombine.low %v1207_v56, %v1219_v12  ;;  %v314_v62 = vshrl.u32 %v1094_v50, 16  ;;  %vm1240_vm11 = vmor %vm282_vm9, %vm283_vm10 }
  0x1e   :  { %v317_v1 = vshll.u32 %v1094_v50, 16  ;;  %518 = vrot.lane.b32.xlu1 %v1211_v10, %s967_s0  ;;  %v323_v6 = vshll.u32 %v1098_v51, 16  ;;  %v328_v7 = vshrl.u32 %v838_v19, 16  ;;  %v331_v11 = vshll.u32 %v838_v19, 16 }
  0x1f   :  { %v848_v2 = vrot.slane %v832_v57, 9  ;;  %v402_v4 = vrot.slane %v833_v59, 5  ;;  %v316_v8 = vrot.slane %v314_v62, 4  ;;  %v337_v13 = vshll.u32 %v839_v38, 16 }
  0x20   :  { %v319_v9 = vrot.slane %v317_v1, 5  ;;  %v325_v16 = vrot.slane %v323_v6, 5  ;;  %v330_v18 = vrot.slane %v328_v7, 4  ;;  %v286_v50 = vshrl.u32 %v832_v57, 16 }
  0x21   :  { %v1232_v15 = vsel %vm1106_vm8, %v848_v2, %v402_v4  ;;  %v333_v24 = vrot.slane %v331_v11, 5  ;;  %v339_v26 = vrot.slane %v337_v13, 5  ;;  %v289_v28 = vshll.u32 %v832_v57, 16 }
  0x22   :  { %v870_v21 = vcombine.low %v1232_v15, %v1156_v20  ;;  %v320_v23 = vor.u32 %v319_v9, %v316_v8  ;;  %520 = vrot.lane.b32.xlu1 %v1195_v49, %s967_s0  ;;  %v288_v19 = vrot.slane %v286_v50, 4  ;;  %v295_v35 = vshll.u32 %v833_v59, 16 }
  0x23   :  { %v300_v36 = vshrl.u32 %v1086_v47, 16  ;;  %v334_v39 = vor.u32 %v333_v24, %v330_v18  ;;  %v303_v40 = vshll.u32 %v1086_v47, 16  ;;  %v309_v41 = vshll.u32 %v1090_v48, 16 }
  0x24   :  { %514 = vrot.lane.b32.xlu0 %v870_v21, %s967_s0  ;;  %v321_v38 = vrot.slane %v320_v23, 4  ;;  %v291_v44 = vrot.slane %v289_v28, 5  ;;  %v297_v45 = vrot.slane %v295_v35, 5  ;;  %v370_v53 = vshrl.u32 %v1060_v33, 16 }
  0x25   :  { %v302_v52 = vrot.slane %v300_v36, 4  ;;  %v335_v57 = vrot.slane %v334_v39, 4  ;;  %v305_v59 = vrot.slane %v303_v40, 5  ;;  %v311_v1 = vrot.slane %v309_v41, 5 }
  0x26   :  { %v1251_v62 = vsel %vm1240_vm11, %v321_v38, %v325_v16  ;;  %v292_v2 = vor.u32 %v291_v44, %v288_v19  ;;  %v372_v4 = vrot.slane %v370_v53, 4  ;;  %v373_v6 = vshll.u32 %v1060_v33, 16 }
  0x27   :  { %v379_v47 = vshll.u32 %v1064_v34, 16  ;;  %v1259_v48 = vsel %vm1240_vm11, %v335_v57, %v339_v26  ;;  %v306_v7 = vor.u32 %v305_v59, %v302_v52  ;;  %v384_v8 = vshrl.u32 %v1125_v0, 16 }
  0x28   :  { %516 = vrot.lane.b32.xlu0 %v1223_v61, %s967_s0  ;;  %v387_v9 = vshll.u32 %v1125_v0, 16  ;;  %v1265_v11 = vcombine.low %v1251_v62, %v1259_v48  ;;  %v293_v13 = vrot.slane %v292_v2, 4  ;;  %v375_v33 = vrot.slane %v373_v6, 5 }
  0x29   :  { %v381_v16 = vrot.slane %v379_v47, 5  ;;  %v307_v34 = vrot.slane %v306_v7, 4  ;;  %v386_v18 = vrot.slane %v384_v8, 4  ;;  %v393_v21 = vshll.u32 %v1148_v17, 16 }
  0x2a   :  { %v389_v50 = vrot.slane %v387_v9, 5  ;;  %496 = vrot.lane.b32.xlu1 %v1265_v11, %s968_s8  ;;  %v1272_v23 = vsel %vm1240_vm11, %v293_v13, %v297_v45  ;;  %v376_v0 = vor.u32 %v375_v33, %v372_v4  ;;  %v342_v24 = vshrl.u32 %v1167_v27, 16 }
  0x2b   :  { %v345_v26 = vshll.u32 %v1167_v27, 16  ;;  %v312_v19 = vsel %vm1240_vm11, %v307_v34, %v311_v1  ;;  %v395_v35 = vrot.slane %v393_v21, 5  ;;  %v351_v17 = vshll.u32 %v1173_v32, 16 }
  0x2c   :  { %v390_v28 = vor.u32 %v389_v50, %v386_v18  ;;  %v866_v36 = vcombine.low %v1272_v23, %v312_v19  ;;  %v377_v38 = vrot.slane %v376_v0, 4  ;;  %v344_v39 = vrot.slane %v342_v24, 4 }
  0x2d   :  { %v347_v40 = vrot.slane %v345_v26, 5  ;;  %v356_v44 = vshrl.u32 %v1052_v30, 16  ;;  %v359_v45 = vshll.u32 %v1052_v30, 16  ;;  %v353_v53 = vrot.slane %v351_v17, 5 }
  0x2e   :  { %v391_v41 = vrot.slane %v390_v28, 4  ;;  %494 = vrot.lane.b32.xlu0 %v866_v36, %s968_s8  ;;  %v382_v27 = vsel %vm1240_vm11, %v377_v38, %v381_v16  ;;  %v365_v57 = vshll.u32 %v1056_v31, 16  ;;  %v857_v2 = vcombine.high %v1121_v63, %v1121_v63 }
  0x2f   :  { %v348_v52 = vor.u32 %v347_v40, %v344_v39  ;;  %v358_v59 = vrot.slane %v356_v44, 4  ;;  %v361_v1 = vrot.slane %v359_v45, 5  ;;  %v438_v30 = vshrl.u32 %v1129_v3, 16 }
  0x30   :  { %v396_v32 = vsel %vm1240_vm11, %v391_v41, %v395_v35  ;;  %v367_v7 = vrot.slane %v365_v57, 5  ;;  %v441_v8 = vshll.u32 %v1129_v3, 16  ;;  %v447_v9 = vshll.u32 %v857_v2, 16 }
  0x31   :  { %v869_v4 = vcombine.low %v382_v27, %v396_v32  ;;  %v349_v6 = vrot.slane %v348_v52, 4  ;;  %v362_v47 = vor.u32 %v361_v1, %v358_v59  ;;  %v440_v31 = vrot.slane %v438_v30, 4 }
  0x32   :  { %v443_v16 = vrot.slane %v441_v8, 5  ;;  %v449_v50 = vrot.slane %v447_v9, 5  ;;  %v878_v26 = vcombine.low %v312_v19, %v1251_v62  ;;  %v862_v28 = vcombine.low %v1203_v55, %v1078_v43 }
  0x33   :  { %500 = vrot.lane.b32.xlu1 %v869_v4, %s968_s8  ;;  %v354_v13 = vsel %vm1240_vm11, %v349_v6, %v353_v53  ;;  %v363_v33 = vrot.slane %v362_v47, 4  ;;  %v858_v17 = vrot.slane %v1129_v3, 9  ;;  %v453_v36 = vrot.slane %v857_v2, 5 }
  0x34   :  { %v444_v18 = vor.u32 %v443_v16, %v440_v31  ;;  %v879_v39 = vcombine.low %v1259_v48, %v354_v13  ;;  %v884_v40 = vcombine.low %v1135_v5, %v1178_v37  ;;  %v882_v51 = vcombine.low %v1156_v20, %v1207_v56  ;;  %v939_v20 = vld [vmem:[%s1408_s3] sm:$0xff]  }
  0x35   :  { %v368_v34 = vsel %vm1240_vm11, %v363_v33, %v367_v7  ;;  %v454_v62 = vsel %vm1106_vm8, %v858_v17, %v453_v36  ;;  %v883_v19 = vcombine.low %v1219_v12, %v1199_v54  ;;  %v1316_v48 = vcombine.low %v1048_v29, %v1115_v60  ;;  %v940_v60 = vld [vmem:[%s1408_s3 + $0x8] sm:$0x3f]   ;;  %902 = vmatprep.subr.bf16.mxu0 %v939_v20  ;;  %s974_s3 = smov 24  }
  0x36   :  { %v868_v21 = vcombine.low %v354_v13, %v368_v34  ;;  %v880_v0 = vcombine.low %v368_v34, %v382_v27  ;;  %v445_v24 = vrot.slane %v444_v18, 4  ;;  %v885_v3 = vcombine.low %v1188_v42, %v454_v62  ;;  %914 = vmatprep.subr.bf16.mxu1 %v939_v20  ;;  %903 = vmatpush3.bf16.msra.mxu0 %v939_v20 }
  0x37   :  { %v1321_v58 = vcombine.low %v1082_v46, %v1144_v14  ;;  %v886_v5 = vcombine.low %v1121_v63, %v1203_v55  ;;  %v864_v29 = vcombine.low %v1161_v22, %v1041_v25  ;;  %vm697_vm12 = vcmask 1045504   ;;  %916 = vmatpush3.bf16.msra.mxu1 %v939_v20 }
  0x38   :  { %498 = vrot.lane.b32.xlu0 %v868_v21, %s968_s8  ;;  %543 = vrot.lane.b32.xlu1 %v880_v0, %s969_s9  ;;  %v450_v35 = vsel %vm1240_vm11, %v445_v24, %v449_v50  ;;  %v972_v46 = vmov 65535   ;;  %v888_v25 = vcombine.low %v454_v62, %v1232_v15  ;;  %vm589_vm13 = vcmask 23552  }
  0x39   :  { %v881_v38 = vcombine.low %v396_v32, %v450_v35  ;;  %v698_v14 = vsel %vm229_vm2, 4294967295, %v972_v46  ;;  %v887_v42 = vcombine.low %v450_v35, %v1272_v23  ;;  %vm602_vm14 = vcmask 48128  }
  0x3a   :  { %v699_v63 = vsel %vm697_vm12, %v698_v14, 0  ;;  %vm611_vm15 = vcmask 72704   ;;  %vm620_vm0 = vcmask 97280   ;;  %vm629_vm1 = vcmask 121856  }
  0x3b   :  { %v701_v37 = vand.u32 %v940_v60, %v699_v63  ;;  %vm638_vm2 = vcmask 146432   ;;  %vm647_vm3 = vcmask 171008   ;;  %vm656_vm4 = vcmask 195584  }
  0x3c   :  { %539 = vrot.lane.b32.xlu0 %v878_v26, %s969_s9  ;;  %545 = vrot.lane.b32.xlu1 %v881_v38, %s969_s9  ;;  %vm687_vm5 = vcmask 220160   ;;  %vm784_vm6 = vcmask 257024  }
  0x3d   :  { %904 = vmatprep.subr.bf16.mxu0 %v701_v37  ;;  %915 = vmatprep.subr.bf16.mxu1 %v701_v37 }
  0x3e   :  { %905 = vmatpush3.bf16.msra.mxu0 %v701_v37  ;;  %917 = vmatpush3.bf16.msra.mxu1 %v701_v37 }
  0x40   :  { %541 = vrot.lane.b32.xlu0 %v879_v39, %s969_s9  ;;  %556 = vrot.lane.b32.xlu1 %v884_v40, %s970_s10 }
  0x44   :  { %552 = vrot.lane.b32.xlu0 %v882_v51, %s970_s10  ;;  %558 = vrot.lane.b32.xlu1 %v885_v3, %s970_s10 }
  0x48   :  { %554 = vrot.lane.b32.xlu0 %v883_v19, %s970_s10  ;;  %565 = vrot.lane.b32.xlu1 %v1316_v48, %s971_s11 }
  0x4c   :  { %561 = vrot.lane.b32.xlu0 %v1321_v58, %s971_s11  ;;  %567 = vrot.lane.b32.xlu1 %v886_v5, %s971_s11 }
  0x50   :  { %563 = vrot.lane.b32.xlu0 %v864_v29, %s971_s11  ;;  %575 = vrot.lane.b32.xlu1 %v869_v4, %s973_s16 }
  0x54   :  { %571 = vrot.lane.b32.xlu0 %v1265_v11, %s973_s16  ;;  %577 = vrot.lane.b32.xlu1 %v887_v42, %s973_s16 }
  0x58   :  { %573 = vrot.lane.b32.xlu0 %v868_v21, %s973_s16  ;;  %585 = vrot.lane.b32.xlu1 %v1195_v49, %s974_s3 }
  0x5c   :  { %581 = vrot.lane.b32.xlu0 %v1223_v61, %s974_s3  ;;  %587 = vrot.lane.b32.xlu1 %v888_v25, %s974_s3 }
  0x60   :  { %583 = vrot.lane.b32.xlu0 %v1211_v10, %s974_s3 }
  0x7f   :  { %v531_v22 = vpop.permute.xlu1 %530 }
  0x82   :  { %v527_v54 = vpop.permute.xlu0 %526 }
  0x86   :  { %v533_v56 = vpop.permute.xlu1 %532 }
  0x8b   :  { %v529_v12 = vpop.permute.xlu0 %528 }
  0x90   :  { %v519_v23 = vpop.permute.xlu1 %518 }
  0x94   :  { %v521_v44 = vpop.permute.xlu1 %520 }
  0x96   :  { %v515_v41 = vpop.permute.xlu0 %514 }
  0x9a   :  { %v517_v11 = vpop.permute.xlu0 %516 }
  0x9c   :  { %v497_v45 = vpop.permute.xlu1 %496 }
  0x9d   :  { %v595_v43 = vsel %vm589_vm13, %v1321_v58, %v497_v45 }
  0x9e   :  { %v606_v17 = vsel %vm602_vm14, %v595_v43, %v517_v11 }
  0x9f   :  { %v615_v19 = vsel %vm611_vm15, %v606_v17, %v529_v12 }
  0xa0   :  { %v495_v27 = vpop.permute.xlu0 %494 }
  0xa1   :  { %v592_v9 = vsel %vm589_vm13, %v862_v28, %v495_v27 }
  0xa2   :  { %v604_v34 = vsel %vm602_vm14, %v592_v9, %v515_v41 }
  0xa3   :  { %v613_v0 = vsel %vm611_vm15, %v604_v34, %v527_v54 }
  0xa5   :  { %v501_v52 = vpop.permute.xlu1 %500 }
  0xa6   :  { %v601_v31 = vsel %vm589_vm13, %v1316_v48, %v501_v52 }
  0xa7   :  { %v610_v18 = vsel %vm602_vm14, %v601_v31, %v521_v44 }
  0xa8   :  { %v619_v24 = vsel %vm611_vm15, %v610_v18, %v533_v56 }
  0xaa   :  { %v499_v53 = vpop.permute.xlu0 %498  ;;  %v544_v49 = vpop.permute.xlu1 %543 }
  0xab   :  { %v598_v4 = vsel %vm589_vm13, %v864_v29, %v499_v53 }
  0xac   :  { %v608_v47 = vsel %vm602_vm14, %v598_v4, %v519_v23 }
  0xad   :  { %v617_v13 = vsel %vm611_vm15, %v608_v47, %v531_v22  ;;  %v889_v22 = vld [vmem:[%s1409_s4] ss:$0 sm:$0xff]  ;;  %s975_s4 = smov [#allocation2]  }
  0xae   :  { %v540_v57 = vpop.permute.xlu0 %539  ;;  %v546_v15 = vpop.permute.xlu1 %545  ;;  %v626_v50 = vsel %vm620_vm0, %v617_v13, %v544_v49  ;;  %s798_s19 = sshll.u32 %s975_s4, 4  ;;  %s799_s19 = int_to_ptr.vmem [resolvable:$true] %s798_s19 }
  0xaf   :  { %v622_v36 = vsel %vm620_vm0, %v613_v0, %v540_v57  ;;  %v628_v38 = vsel %vm620_vm0, %v619_v24, %v546_v15  ;;  %s941_s20 = scalar_lea.vmem %s799_s19, 512  ;;  %p946_p1 = scmp.lt.s32.totalorder %s799_s19, %s799_s19 }
  0xb0   :  { %p942_p0 = scmp.ne.s32.totalorder %s799_s19, %s941_s20  ;;  %p947_p2 = scmp.lt.s32.totalorder %s941_s20, %s941_s20 }
  0xb2   :  { %v542_v32 = vpop.permute.xlu0 %541  ;;  %v557_v61 = vpop.permute.xlu1 %556  ;;  %p948_p3 = por %p947_p2, %p946_p1 }
  0xb3   :  { %v635_v55 = vsel %vm629_vm1, %v626_v50, %v557_v61  ;;  %v624_v29 = vsel %vm620_vm0, %v615_v19, %v542_v32 }
  0xb4   :  { %p949_p4 = pnand %p948_p3, %p942_p0 }
  0xb6   :  { %v553_v59 = vpop.permute.xlu0 %552  ;;  %v559_v1 = vpop.permute.xlu1 %558 }
  0xb7   :  { %v631_v40 = vsel %vm629_vm1, %v622_v36, %v553_v59  ;;  %v637_v62 = vsel %vm629_vm1, %v628_v38, %v559_v1 }
  0xba   :  { %v555_v10 = vpop.permute.xlu0 %554  ;;  %v566_v2 = vpop.permute.xlu1 %565 }
  0xbb   :  { %v644_v21 = vsel %vm638_vm2, %v635_v55, %v566_v2  ;;  %v633_v14 = vsel %vm629_vm1, %v624_v29, %v555_v10 }
  0xbe   :  { %v562_v6 = vpop.permute.xlu0 %561  ;;  %v568_v30 = vpop.permute.xlu1 %567 }
  0xbf   :  { %v640_v51 = vsel %vm638_vm2, %v631_v40, %v562_v6  ;;  %v646_v3 = vsel %vm638_vm2, %v637_v62, %v568_v30 }
  0xc2   :  { %v564_v7 = vpop.permute.xlu0 %563  ;;  %v576_v8 = vpop.permute.xlu1 %575 }
  0xc3   :  { %v653_v26 = vsel %vm647_vm3, %v644_v21, %v576_v8  ;;  %v642_v63 = vsel %vm638_vm2, %v633_v14, %v564_v7 }
  0xc6   :  { %v572_v33 = vpop.permute.xlu0 %571  ;;  %v578_v16 = vpop.permute.xlu1 %577 }
  0xc7   :  { %v649_v48 = vsel %vm647_vm3, %v640_v51, %v572_v33  ;;  %v655_v58 = vsel %vm647_vm3, %v646_v3, %v578_v16 }
  0xca   :  { %v574_v28 = vpop.permute.xlu0 %573  ;;  %v586_v35 = vpop.permute.xlu1 %585 }
  0xcb   :  { %v662_v39 = vsel %vm656_vm4, %v653_v26, %v586_v35  ;;  %v651_v37 = vsel %vm647_vm3, %v642_v63, %v574_v28 }
  0xcc   :  { %910 = vmatprep.mubr.msk.bf16.mxu1 %vm687_vm5, %v662_v39 }
  0xce   :  { %v582_v5 = vpop.permute.xlu0 %581  ;;  %v588_v20 = vpop.permute.xlu1 %587 }
  0xcf   :  { %v658_v60 = vsel %vm656_vm4, %v649_v48, %v582_v5  ;;  %v664_v46 = vsel %vm656_vm4, %v655_v58, %v588_v20 }
  0xd0   :  { %906 = vmatprep.mubr.msk.bf16.mxu0 %vm687_vm5, %v658_v60  ;;  %911 = vmatmul.mubr.msk.bf16.vlgmr.msra.gmra.mrb[0].mxu1 %vm687_vm5, %v664_v46 }
  0xd2   :  { %v584_v42 = vpop.permute.xlu0 %583 }
  0xd3   :  { %v660_v25 = vsel %vm656_vm4, %v651_v37, %v584_v42 }
  0xd4   :  { %907 = vmatmul.mubr.msk.bf16.vlgmr.msra.gmra.mrb[0].mxu0 %vm687_vm5, %v660_v25 }
 0x1a3   :  { %v912_v54 = vpop.f32.mrb[0].mxu1 }
 0x1a4   :  { %v762_v56 = vadd.f32 %v912_v54, %v889_v22  ;;  %v753_v12 = vpop.f32.mrb[1].mxu1 }
 0x1a5   :  { %v754_v23 = vadd.f32 %v889_v22, %v753_v12  ;;  %v913_v41 = vpop.f32.mrb[2].mxu1 }
 0x1a6   :  { %v774_v44 = vmax.f32 %v762_v56, 0.0  ;;  %v765_v11 = vadd.f32 %v913_v41, %v889_v22  ;;  %v756_v45 = vpop.f32.mrb[3].mxu1 }
 0x1a7   :  { %v908_v27 = vpop.f32.mrb[0].mxu0  ;;  %v772_v52 = vmax.f32 %v754_v23, 0.0  ;;  %v757_v53 = vadd.f32 %v889_v22, %v756_v45 }
 0x1a8   :  { %v746_v49 = vadd.f32 %v908_v27, %v889_v22  ;;  %v782_v57 = vpack.c.bf16 %v774_v44, %v774_v44  ;;  %v737_v15 = vpop.f32.mrb[1].mxu0  ;;  %v775_v32 = vmax.f32 %v765_v11, 0.0 }
 0x1a9   :  { %v738_v61 = vadd.f32 %v889_v22, %v737_v15  ;;  %v780_v59 = vpack.c.bf16 %v772_v52, %v772_v52  ;;  %v909_v1 = vpop.f32.mrb[2].mxu0  ;;  %v773_v10 = vmax.f32 %v757_v53, 0.0 }
 0x1aa   :  { %v770_v2 = vmax.f32 %v746_v49, 0.0  ;;  %791 = vst.msk [vmem:[#allocation2 + $0x18] sm:$0xf] %vm784_vm6, %v782_v57  ;;  %v749_v4 = vadd.f32 %v909_v1, %v889_v22  ;;  %v783_v6 = vpack.c.bf16 %v775_v32, %v775_v32  ;;  %v740_v30 = vpop.f32.mrb[3].mxu0 }
 0x1ab   :  { %v768_v47 = vmax.f32 %v738_v61, 0.0  ;;  %789 = vst.msk [vmem:[#allocation2 + $0x10] sm:$0xf] %vm784_vm6, %v780_v59  ;;  %v741_v7 = vadd.f32 %v889_v22, %v740_v30  ;;  %v781_v8 = vpack.c.bf16 %v773_v10, %v773_v10 }
 0x1ac   :  { %v778_v9 = vpack.c.bf16 %v770_v2, %v770_v2  ;;  %v771_v31 = vmax.f32 %v749_v4, 0.0  ;;  %792 = vst.msk [vmem:[#allocation2 + $0x1c] sm:$0xf] %vm784_vm6, %v783_v6 }
 0x1ad   :  { %v776_v13 = vpack.c.bf16 %v768_v47, %v768_v47  ;;  %v769_v33 = vmax.f32 %v741_v7, 0.0  ;;  %790 = vst.msk [vmem:[#allocation2 + $0x14] sm:$0xf] %vm784_vm6, %v781_v8 }
 0x1ae   :  { %787 = vst.msk [vmem:[#allocation2 + $0x8] sm:$0xf] %vm784_vm6, %v778_v9  ;;  %v779_v16 = vpack.c.bf16 %v771_v31, %v771_v31 }
 0x1af   :  { %785 = vst.msk [vmem:[#allocation2] sm:$0xf] %vm784_vm6, %v776_v13  ;;  %v777_v34 = vpack.c.bf16 %v769_v33, %v769_v33 }
 0x1b0   :  { %788 = vst.msk [vmem:[#allocation2 + $0xc] sm:$0xf] %vm784_vm6, %v779_v16 }
 0x1b1   :  { %786 = vst.msk [vmem:[#allocation2 + $0x4] sm:$0xf] %vm784_vm6, %v777_v34 }
 0x1b2   :  { %952 = shalt.err (!%p949_p4)
}
 0x1b3   :  { %s953_s2 = scalar_lea.hbm %s1410_s5, 512 }
 0x1b4   :  { %p954_p5 = scmp.ne.s32.totalorder %s1410_s5, %s953_s2  ;;  %p957_p6 = scmp.lt.u32.totalorder %s953_s2, %s1410_s5 }
 0x1b6   :  { %p959_p7 = pnand %p957_p6, %p954_p5 }
 0x1b8   :  { %962 = shalt.err (!%p959_p7)
}
 0x1b9   :  { %s976_s26 = smov 64   ;;  %s977_s27 = smov 4  }
 0x1ba   :  { %804 = dma.vmem_to_hbm [thread:$0]  %s799_s19, 512, %s1410_s5, [#allocation3], %s976_s26, %s976_s26, %s977_s27  }
 0x1bb   :  { %963 = dma.done.wait [#allocation3], 512  }
 0x1bc   :  { %964 = vsyncadd [#allocation3], 4294966784 }
 0x1bd   :  { %808 = vsyncpa [#allocation3], 1 }

</bundles_post_ra>
